<compile_context>
chip_gen: v7x
topology: tpu7x:2x2x1
jax: 0.10.0
libtpu: 0.0.40
codegen_flags: <defaults>
</compile_context>

<pallas_src>
import math
import jax
import jax.numpy as jnp
from jax.experimental import pallas as pl
from jax.experimental.pallas import tpu as pltpu


def attention_kernel(s_ref, enc_ref, w_s_ref, w_e_ref, v_ref, out_ref):
    # s_ref   : [TB, D]       f32   decoder states (cast to bf16 only for the MXU)
    # enc_ref : [TB*S, E2]    bf16  encoder outputs, flattened in the wrapper
    # w_s_ref : [D,  D]       bf16  W_attn^T rows for the `s` part of the concat
    # w_e_ref : [E2, D]       bf16  W_attn^T rows for the `enc_output` part
    # v_ref   : [1,  D]       f32   v weight (used as VPU multiply + lane reduce)
    # out_ref : [TB, S]       f32   softmax attention weights
    TB, S = out_ref.shape
    D = s_ref.shape[1]

    # Linear over the concatenated feature, computed as two matmuls (concat split):
    #   concat(s, enc) @ W_attn^T == s @ W_s^T + enc @ W_e^T
    # Both are bf16 single-pass MXU matmuls with f32 accumulation.
    proj_enc = jnp.dot(enc_ref[...], w_e_ref[...],
                       preferred_element_type=jnp.float32)                 # [TB*S, D] f32
    proj_s = jnp.dot(s_ref[...].astype(jnp.bfloat16), w_s_ref[...],
                     preferred_element_type=jnp.float32)                   # [TB, D]   f32

    # Split the leading dim only (lane dim D untouched -> no relayout for S % 8 == 0);
    # the large enc operand itself was flattened at the JAX level, never in-kernel.
    energy = jnp.tanh(proj_enc.reshape(TB, S, D) + proj_s[:, None, :])     # [TB, S, D] f32

    # v-projection as a VPU multiply + XLU lane reduce (avoids a degenerate N=1 matmul).
    scores = jnp.sum(energy * v_ref[...][None, :, :], axis=-1)             # [TB, S] f32

    # Softmax over src_len (dim=1 of the [B, S] output), all f32, EXACT divide so every
    # row sums to 1 to f32 precision.
    m = jnp.max(scores, axis=-1, keepdims=True)                            # [TB, 1]
    e = jnp.exp(scores - m)                                                # [TB, S]
    denom = jnp.sum(e, axis=-1, keepdims=True)                             # [TB, 1]
    out_ref[...] = (e / denom).astype(out_ref.dtype)


def prepare_attention_params(w_attn, w_v):
    """One-time parameter preprocessing (do NOT call per forward).

    w_attn : [D, D + E2] f32  (PyTorch nn.Linear(E2 + D, D, bias=False).weight;
                               torch.cat puts `s` first, so the first D input columns
                               belong to `s`.)
    w_v    : [1, D]      f32  (PyTorch nn.Linear(D, 1, bias=False).weight)
    returns (w_s [D, D] bf16, w_e [E2, D] bf16, v_row [1, D] f32)
    """
    D = w_attn.shape[0]
    w_attn_t = w_attn.T                              # [D + E2, D]
    w_s = w_attn_t[:D, :].astype(jnp.bfloat16)       # [D,  D]
    w_e = w_attn_t[D:, :].astype(jnp.bfloat16)       # [E2, D]
    v_row = w_v.astype(jnp.float32)                  # [1,  D] stays f32 (VPU reduce)
    return w_s, w_e, v_row


def attention_forward(s, enc_output, w_s, w_e, v_row, *, batch_tile=None):
    """
    s          : [B, D]      f32
    enc_output : [B, S, E2]  f32 or bf16 (bf16 preferred: halves dominant HBM traffic)
    w_s        : [D, D]      bf16
    w_e        : [E2, D]     bf16
    v_row      : [1, D]      f32
    returns    : [B, S]      f32 softmax attention weights
    """
    B, D = s.shape
    _, S, E2 = enc_output.shape

    # Batch-tile heuristic: whole batch for small B (per-step overhead ~0.35us dominates);
    # for larger batches keep >= 2 grid steps so both v7x TensorCores get work and the
    # next enc tile can be prefetched while the current one computes.
    if batch_tile is None:
        half = B // 2
        TB = half if (B % 2 == 0 and half >= 8 and half % 8 == 0) else B
    else:
        TB = batch_tile
    assert B % TB == 0, "batch_tile must divide the batch size"
    assert TB == B or TB % 8 == 0, "sub-batch tiles must be a multiple of 8 (sublane tile)"
    grid = (B // TB,)

    # Flatten in the wrapper (free XLA metadata) so the kernel sees a plain 2-D
    # [TB*S, E2] tile and never reshapes the big enc operand inside VMEM.
    enc_flat = enc_output.reshape(B * S, E2)
    if enc_flat.dtype != jnp.bfloat16:
        enc_flat = enc_flat.astype(jnp.bfloat16)

    # VMEM budget for this tiling (2x headroom), instead of relying on the scoped
    # default (16 MiB on v5e / 32 MiB on v6e & v7x).
    est_vmem = (
        2 * TB * S * E2 * 2          # enc tile, double buffered, bf16
        + 2 * TB * D * 4             # s tile, double buffered, f32
        + (D * D + E2 * D) * 2       # weights, single buffered, bf16
        + D * 4                      # v row
        + 2 * TB * S * 4             # output tile, double buffered, f32
        + 4 * TB * S * D * 4         # proj/energy f32 intermediates
    )
    vmem_limit = int(min(100 * 2**20, max(32 * 2**20, 2 * est_vmem)))

    grid_spec = pltpu.PrefetchScalarGridSpec(
        num_scalar_prefetch=0,
        grid=grid,
        in_specs=[
            pl.BlockSpec((TB, D), lambda b: (b, 0)),
            pl.BlockSpec((TB * S, E2), lambda b: (b, 0)),
            # Grid-invariant weights: one VMEM buffer is enough (no double buffering).
            pl.BlockSpec((D, D), lambda b: (0, 0), pipeline_mode=pl.Buffered(1)),
            pl.BlockSpec((E2, D), lambda b: (0, 0), pipeline_mode=pl.Buffered(1)),
            pl.BlockSpec((1, D), lambda b: (0, 0), pipeline_mode=pl.Buffered(1)),
        ],
        out_specs=pl.BlockSpec((TB, S), lambda b: (b, 0)),
    )

    # TODO(synk): the usual consumer immediately computes context = attn @ enc_output;
    # fusing that bmm here (enc tile already resident in VMEM) would halve total enc HBM
    # traffic, but it changes the module's interface, so it is left to the caller.
    return pl.pallas_call(
        attention_kernel,
        out_shape=jax.ShapeDtypeStruct((B, S), jnp.float32),
        grid_spec=grid_spec,
        compiler_params=pltpu.CompilerParams(
            dimension_semantics=("parallel",),
            vmem_limit_bytes=vmem_limit,
        ),
    )(s, enc_flat, w_s, w_e, v_row)


def kaiming_uniform(key, shape):
    # Matches nn.init.kaiming_uniform_ defaults (a=0 -> gain=sqrt(2)),
    # fan_in = shape[1] for a Linear weight [out, in]; bound = sqrt(6 / fan_in).
    fan_in = shape[1]
    bound = math.sqrt(6.0 / fan_in)
    return jax.random.uniform(key, shape, jnp.float32, minval=-bound, maxval=bound)


if __name__ == "__main__":
    # Small shapes: batch=2, src_len=8, enc_hid=16 (so enc feature = 32), dec_hid=32
    B, S, ENC_HID, DEC_HID = 2, 8, 16, 32
    E2 = 2 * ENC_HID

    key = jax.random.PRNGKey(0)
    k1, k2, k3, k4 = jax.random.split(key, 4)

    s = jax.random.normal(k1, (B, DEC_HID), jnp.float32)
    enc_output = jax.random.normal(k2, (B, S, E2), jnp.float32)

    # Parameters (deterministic, Kaiming-uniform like the module's __init__).
    w_attn = kaiming_uniform(k3, (DEC_HID, E2 + DEC_HID))   # nn.Linear(E2+D, D, bias=False)
    w_v = kaiming_uniform(k4, (1, DEC_HID))                 # nn.Linear(D, 1, bias=False)

    # One-time weight preprocessing (kept out of the per-call path).
    w_s, w_e, v_row = prepare_attention_params(w_attn, w_v)
    w_s, w_e, v_row = jax.block_until_ready((w_s, w_e, v_row))

    out = attention_forward(s, enc_output, w_s, w_e, v_row)
    out = jax.block_until_ready(out)

    # Reference 1: full-f32 math mirroring the PyTorch forward exactly (concat form).
    s_rep = jnp.repeat(s[:, None, :], S, axis=1)                     # [B, S, D]
    cat = jnp.concatenate([s_rep, enc_output], axis=2)               # [B, S, D+E2]
    energy_f32 = jnp.tanh(jnp.einsum("bsk,dk->bsd", cat, w_attn))    # [B, S, D]
    att_f32 = jnp.einsum("bsd,od->bso", energy_f32, w_v)[..., 0]     # [B, S]
    ref_f32 = jax.nn.softmax(att_f32, axis=1)

    # Reference 2: the same math at the kernel's operand precision (bf16 matmul inputs,
    # f32 accumulation, f32 softmax) — isolates structural errors from the expected
    # bf16 quantization of the MXU operands.
    proj_e_ref = jnp.dot(enc_output.reshape(B * S, E2).astype(jnp.bfloat16), w_e,
                         preferred_element_type=jnp.float32).reshape(B, S, DEC_HID)
    proj_s_ref = jnp.dot(s.astype(jnp.bfloat16), w_s,
                         preferred_element_type=jnp.float32)
    energy_bf = jnp.tanh(proj_e_ref + proj_s_ref[:, None, :])
    att_bf = jnp.sum(energy_bf * v_row[None, :, :], axis=-1)
    ref_bf = jax.nn.softmax(att_bf, axis=1)

    assert out.shape == (B, S)
    assert jnp.allclose(out, ref_bf, atol=2e-3, rtol=2e-3), "mismatch vs bf16-matched reference"
    assert jnp.allclose(out, ref_f32, atol=2e-2, rtol=0.0), "mismatch vs f32 reference"
    # Exact divide in the kernel softmax -> rows sum to 1 to f32 precision.
    assert jnp.allclose(jnp.sum(out, axis=1), jnp.ones((B,)), atol=1e-4)

    print("KERNEL_OK")
</pallas_src>

<mosaic_0001>
module attributes {stable_mosaic.version = 11 : i64} {
  func.func @attention_kernel(%arg0: i32, %arg1: memref<2x32xf32, #tpu.memory_space<vmem>>, %arg2: memref<16x32xbf16, #tpu.memory_space<vmem>>, %arg3: memref<32x32xbf16, #tpu.memory_space<vmem>>, %arg4: memref<32x32xbf16, #tpu.memory_space<vmem>>, %arg5: memref<1x32xf32, #tpu.memory_space<vmem>>, %arg6: memref<2x8xf32, #tpu.memory_space<vmem>>) attributes {dimension_semantics = [#tpu.dimension_semantics<parallel>], iteration_bounds = array<i64: 1>, scalar_prefetch = 0 : i64, scratch_operands = 0 : i64, tpu.core_type = #tpu.core_type<tc>, window_params = [{transform_indices = @transform_0, window_bounds = array<i64: 2, 32>}, {transform_indices = @transform_1, window_bounds = array<i64: 16, 32>}, {pipeline_mode = #tpu.pipeline_mode<synchronous>, transform_indices = @transform_2, window_bounds = array<i64: 32, 32>}, {pipeline_mode = #tpu.pipeline_mode<synchronous>, transform_indices = @transform_3, window_bounds = array<i64: 32, 32>}, {pipeline_mode = #tpu.pipeline_mode<synchronous>, transform_indices = @transform_4, window_bounds = array<i64: 1, 32>}, {transform_indices = @transform_5, window_bounds = array<i64: 2, 8>}]} {
    %c0 = arith.constant 0 : index
    %c0_0 = arith.constant 0 : index
    %0 = vector.load %arg2[%c0, %c0_0] : memref<16x32xbf16, #tpu.memory_space<vmem>>, vector<16x32xbf16>
    %c0_1 = arith.constant 0 : index
    %c0_2 = arith.constant 0 : index
    %1 = vector.load %arg4[%c0_1, %c0_2] : memref<32x32xbf16, #tpu.memory_space<vmem>>, vector<32x32xbf16>
    %cst = arith.constant dense<0.000000e+00> : vector<16x32xf32>
    %2 = tpu.matmul %0, %1, %cst {dimension_numbers = #tpu.dot_dimension_numbers<[1], [0], [0], [1], [0, 0, 1, 1], [], []>} : vector<16x32xbf16>, vector<32x32xbf16>, vector<16x32xf32> -> vector<16x32xf32>
    %c0_3 = arith.constant 0 : index
    %c0_4 = arith.constant 0 : index
    %3 = vector.load %arg1[%c0_3, %c0_4] : memref<2x32xf32, #tpu.memory_space<vmem>>, vector<2x32xf32>
    %4 = arith.truncf %3 : vector<2x32xf32> to vector<2x32xbf16>
    %c0_5 = arith.constant 0 : index
    %c0_6 = arith.constant 0 : index
    %5 = vector.load %arg3[%c0_5, %c0_6] : memref<32x32xbf16, #tpu.memory_space<vmem>>, vector<32x32xbf16>
    %cst_7 = arith.constant dense<0.000000e+00> : vector<2x32xf32>
    %6 = tpu.matmul %4, %5, %cst_7 {dimension_numbers = #tpu.dot_dimension_numbers<[1], [0], [0], [1], [0, 0, 1, 1], [], []>} : vector<2x32xbf16>, vector<32x32xbf16>, vector<2x32xf32> -> vector<2x32xf32>
    %7 = vector.shape_cast %2 : vector<16x32xf32> to vector<2x8x32xf32>
    %8 = vector.shape_cast %6 : vector<2x32xf32> to vector<2x1x32xf32>
    %9 = vector.broadcast %8 : vector<2x1x32xf32> to vector<2x8x32xf32>
    %10 = arith.addf %7, %9 : vector<2x8x32xf32>
    %11 = math.tanh %10 : vector<2x8x32xf32>
    %c0_8 = arith.constant 0 : index
    %c0_9 = arith.constant 0 : index
    %12 = vector.load %arg5[%c0_8, %c0_9] : memref<1x32xf32, #tpu.memory_space<vmem>>, vector<1x32xf32>
    %13 = vector.shape_cast %12 : vector<1x32xf32> to vector<1x1x32xf32>
    %14 = vector.broadcast %13 : vector<1x1x32xf32> to vector<2x8x32xf32>
    %15 = arith.mulf %11, %14 : vector<2x8x32xf32>
    %cst_10 = arith.constant dense<0.000000e+00> : vector<2x8xf32>
    %16 = vector.multi_reduction <add>, %15, %cst_10 [2] : vector<2x8x32xf32> to vector<2x8xf32>
    %cst_11 = arith.constant dense<0xFF800000> : vector<2xf32>
    %17 = vector.multi_reduction <maximumf>, %16, %cst_11 [1] : vector<2x8xf32> to vector<2xf32>
    %18 = vector.shape_cast %17 : vector<2xf32> to vector<2x1xf32>
    %19 = vector.broadcast %18 : vector<2x1xf32> to vector<2x8xf32>
    %20 = arith.subf %16, %19 : vector<2x8xf32>
    %21 = math.exp %20 : vector<2x8xf32>
    %cst_12 = arith.constant dense<0.000000e+00> : vector<2xf32>
    %22 = vector.multi_reduction <add>, %21, %cst_12 [1] : vector<2x8xf32> to vector<2xf32>
    %23 = vector.shape_cast %22 : vector<2xf32> to vector<2x1xf32>
    %24 = vector.broadcast %23 : vector<2x1xf32> to vector<2x8xf32>
    %25 = arith.divf %21, %24 : vector<2x8xf32>
    %c0_13 = arith.constant 0 : index
    %c0_14 = arith.constant 0 : index
    %26 = vector.load %arg6[%c0_13, %c0_14] : memref<2x8xf32, #tpu.memory_space<vmem>>, vector<2x8xf32>
    tpu.vector_store %arg6[%c0_13, %c0_14], %25 {strides = array<i32>} : memref<2x8xf32, #tpu.memory_space<vmem>>, vector<2x8xf32>,
    return
  }
  func.func @transform_0(%arg0: i32) -> (i32, i32) {
    %c0_i32 = arith.constant 0 : i32
    %c0_i32_0 = arith.constant 0 : i32
    return %arg0, %c0_i32 : i32, i32
  }
  func.func @transform_1(%arg0: i32) -> (i32, i32) {
    %c0_i32 = arith.constant 0 : i32
    %c0_i32_0 = arith.constant 0 : i32
    return %arg0, %c0_i32 : i32, i32
  }
  func.func @transform_2(%arg0: i32) -> (i32, i32) {
    %c0_i32 = arith.constant 0 : i32
    %c0_i32_0 = arith.constant 0 : i32
    %c0_i32_1 = arith.constant 0 : i32
    return %c0_i32, %c0_i32_0 : i32, i32
  }
  func.func @transform_3(%arg0: i32) -> (i32, i32) {
    %c0_i32 = arith.constant 0 : i32
    %c0_i32_0 = arith.constant 0 : i32
    %c0_i32_1 = arith.constant 0 : i32
    return %c0_i32, %c0_i32_0 : i32, i32
  }
  func.func @transform_4(%arg0: i32) -> (i32, i32) {
    %c0_i32 = arith.constant 0 : i32
    %c0_i32_0 = arith.constant 0 : i32
    %c0_i32_1 = arith.constant 0 : i32
    return %c0_i32, %c0_i32_0 : i32, i32
  }
  func.func @transform_5(%arg0: i32) -> (i32, i32) {
    %c0_i32 = arith.constant 0 : i32
    %c0_i32_0 = arith.constant 0 : i32
    return %arg0, %c0_i32 : i32, i32
  }
}

</mosaic_0001>

<bundles_post_ra>
// kernel: tpu_custom_call.1
= control target key start
LH: loop header
LB: loop body
LE: loop exit
PB: predicated region body
PF: predicated region fallthrough
CT: control target
= control target key end

     0   :  { %10 = vsyncpa [#allocation3], 0  ;;  %s671_s0 = inlined_call_operand.hbm [shape: f32[2,32], index: 0, kind: input, shape index: {}]   ;;  %s672_s1 = inlined_call_operand.hbm [shape: bf16[16,32], index: 1, kind: input, shape index: {}]   ;;  %s673_s2 = inlined_call_operand.hbm [shape: bf16[32,32], index: 2, kind: input, shape index: {}]   ;;  %s674_s3 = inlined_call_operand.hbm [shape: bf16[32,32], index: 3, kind: input, shape index: {}]   ;;  %s675_s4 = inlined_call_operand.vmem [shape: f32[1,32], index: 4, kind: input, shape index: {}]   ;;  %s676_s5 = inlined_call_operand.hbm [shape: f32[2,8], index: 5, kind: output, shape index: {}]  }
   0x1   :  { %11 = vsyncpa [#allocation6], 0 }
   0x2   :  { %12 = vsyncpa [#allocation9], 0 }
   0x3   :  { %13 = vsyncpa [#allocation4], 0  ;;  %s542_s18 = smov [#allocation5]   ;;  %s424_s22 = scalar_lea.hbm %s672_s1, 128 }
   0x4   :  { %s29_s19 = sshll.u32 %s542_s18, 4  ;;  %p425_p0 = scmp.ne.s32.totalorder %s672_s1, %s424_s22  ;;  %s30_s19 = int_to_ptr.vmem [resolvable:$true] %s29_s19 }
   0x5   :  { %p428_p1 = scmp.lt.u32.totalorder %s424_s22, %s672_s1 }
   0x7   :  { %p430_p2 = pnand %p428_p1, %p425_p0 }
   0x9   :  { %433 = shalt.err (!%p430_p2)
}
   0xa   :  { %s434_s27 = scalar_lea.vmem %s30_s19, 128  ;;  %p439_p4 = scmp.lt.s32.totalorder %s30_s19, %s30_s19 }
   0xb   :  { %p435_p3 = scmp.ne.s32.totalorder %s30_s19, %s434_s27  ;;  %p440_p5 = scmp.lt.s32.totalorder %s434_s27, %s434_s27 }
   0xd   :  { %p441_p6 = por %p440_p5, %p439_p4 }
   0xf   :  { %p442_p7 = pnand %p441_p6, %p435_p3 }
  0x11   :  { %445 = shalt.err (!%p442_p7)
}
  0x12   :  { %s543_s28 = smov 64   ;;  %s544_s29 = smov 4  }
  0x13   :  { %35 = dma.hbm_to_vmem [thread:$0]  %s672_s1, 128, %s30_s19, [#allocation6], %s543_s28, %s543_s28, %s544_s29  }
  0x14   :  { %s545_s7 = smov [#allocation2]   ;;  %s546_s9 = smov [#allocation7]  }
  0x15   :  { %s20_s8 = sshll.u32 %s545_s7, 4  ;;  %s41_s10 = sshll.u32 %s546_s9, 4  ;;  %s21_s8 = int_to_ptr.vmem [resolvable:$true] %s20_s8  ;;  %s42_s10 = int_to_ptr.vmem [resolvable:$true] %s41_s10 }
  0x16   :  { %s446_s13 = scalar_lea.hbm %s671_s0, 32 }
  0x17   :  { %p447_p8 = scmp.ne.s32.totalorder %s671_s0, %s446_s13  ;;  %p450_p9 = scmp.lt.u32.totalorder %s446_s13, %s671_s0 }
  0x19   :  { %p452_p10 = pnand %p450_p9, %p447_p8 }
  0x1b   :  { %455 = shalt.err (!%p452_p10)
}
  0x1c   :  { %s456_s1 = scalar_lea.vmem %s21_s8, 32  ;;  %p461_p12 = scmp.lt.s32.totalorder %s21_s8, %s21_s8 }
  0x1d   :  { %p457_p11 = scmp.ne.s32.totalorder %s21_s8, %s456_s1  ;;  %p462_p13 = scmp.lt.s32.totalorder %s456_s1, %s456_s1 }
  0x1f   :  { %p463_p0 = por %p462_p13, %p461_p12 }
  0x21   :  { %p464_p1 = pnand %p463_p0, %p457_p11 }
  0x23   :  { %467 = shalt.err (!%p464_p1)
}
  0x24   :  { %23 = dma.hbm_to_vmem [thread:$0]  %s671_s0, 32, %s21_s8, [#allocation3]  }
  0x25   :  { %s468_s22 = scalar_lea.hbm %s673_s2, 256 }
  0x26   :  { %p469_p2 = scmp.ne.s32.totalorder %s673_s2, %s468_s22  ;;  %p472_p3 = scmp.lt.u32.totalorder %s468_s22, %s673_s2 }
  0x28   :  { %p474_p4 = pnand %p472_p3, %p469_p2 }
  0x2a   :  { %477 = shalt.err (!%p474_p4)
}
  0x2b   :  { %s478_s27 = scalar_lea.vmem %s42_s10, 256  ;;  %p483_p6 = scmp.lt.s32.totalorder %s42_s10, %s42_s10 }
  0x2c   :  { %p479_p5 = scmp.ne.s32.totalorder %s42_s10, %s478_s27  ;;  %p484_p7 = scmp.lt.s32.totalorder %s478_s27, %s478_s27 }
  0x2e   :  { %p485_p8 = por %p484_p7, %p483_p6 }
  0x30   :  { %p486_p9 = pnand %p485_p8, %p479_p5 }
  0x32   :  { %489 = shalt.err (!%p486_p9)
}
  0x33   :  { %47 = dma.hbm_to_vmem [thread:$0]  %s673_s2, 256, %s42_s10, [#allocation6], %s543_s28, %s543_s28, %s544_s29  }
  0x34   :  { %s547_s6 = smov [#allocation8]   ;;  %s490_s11 = scalar_lea.hbm %s674_s3, 256 }
  0x35   :  { %s53_s7 = sshll.u32 %s547_s6, 4  ;;  %p491_p10 = scmp.ne.s32.totalorder %s674_s3, %s490_s11  ;;  %s54_s7 = int_to_ptr.vmem [resolvable:$true] %s53_s7 }
  0x36   :  { %p494_p11 = scmp.lt.u32.totalorder %s490_s11, %s674_s3 }
  0x38   :  { %p496_p12 = pnand %p494_p11, %p491_p10 }
  0x3a   :  { %499 = shalt.err (!%p496_p12)
}
  0x3b   :  { %s500_s16 = scalar_lea.vmem %s54_s7, 256  ;;  %p505_p0 = scmp.lt.s32.totalorder %s54_s7, %s54_s7 }
  0x3c   :  { %p501_p13 = scmp.ne.s32.totalorder %s54_s7, %s500_s16  ;;  %p506_p1 = scmp.lt.s32.totalorder %s500_s16, %s500_s16 }
  0x3e   :  { %p507_p2 = por %p506_p1, %p505_p0 }
  0x40   :  { %p508_p3 = pnand %p507_p2, %p501_p13 }
  0x42   :  { %511 = shalt.err (!%p508_p3)
}
  0x43   :  { %59 = dma.hbm_to_vmem [thread:$0]  %s674_s3, 256, %s54_s7, [#allocation9], %s543_s28, %s543_s28, %s544_s29  }
  0x44   :  { %534 = dma.done.wait [#allocation3], 32  }
  0x45   :  { %535 = vsyncadd [#allocation3], 4294967264 }
  0x46   :  { %536 = dma.done.wait [#allocation6], 384  }
  0x47   :  { %537 = vsyncadd [#allocation6], 4294966912 }
  0x48   :  { %538 = dma.done.wait [#allocation9], 256  }
  0x49   :  { %539 = vsyncadd [#allocation9], 4294967040  ;;  %v548_v0 = vmov 0.0   ;;  %vm549_vm0 = vmmov 0   ;;  %v407_v1 = vld [vmem:[#allocation7] sm:$0xff]   ;;  %v408_v2 = vld [vmem:[#allocation8] sm:$0xff]   ;;  %v208_v10 = vlaneseq }
  0x4a   :  { %386 = vmatprep.subr.bf16.mxu1 %v548_v0  ;;  %378 = vmatprep.subr.bf16.mxu0 %v548_v0  ;;  %v409_v3 = vld [vmem:[#allocation7 + $0x8] sm:$0xff]   ;;  %v410_v4 = vld [vmem:[#allocation8 + $0x8] sm:$0xff]   ;;  %v143_v5 = vld [vmem:[#allocation2] sm:$0x3]  ;;  %vm98_vm1 = vcmask 261120   ;;  %vm268_vm2 = vcmask 1041409  }
  0x4b   :  { %390 = vmatprep.mubr.msk.bf16.mxu1 %vm549_vm0, %v548_v0  ;;  %382 = vmatprep.mubr.msk.bf16.mxu0 %vm549_vm0, %v548_v0  ;;  %v144_v6 = vpack.c.bf16 %v143_v5, %v143_v5  ;;  %v411_v7 = vld [vmem:[#allocation5] sm:$0xff]   ;;  %v550_v8 = vmov 1966171168   ;;  %v642_v12 = vshrl.u32 %v208_v10, 7  ;;  %v371_v31 = vld [vmem:[%s675_s4] ss:$0 sm:$0xff] }
  0x4c   :  { %387 = vmatpush3.bf16.msra.mxu1 %v407_v1  ;;  %379 = vmatpush3.bf16.msra.mxu0 %v408_v2  ;;  %v206_v9 = vunpack.c.l.s4 %v550_v8  ;;  %v259_v38 = vand.u32 127, %v208_v10  ;;  %vm271_vm3 = vcmask 58368   ;;  %v551_v46 = vmov 0   ;;  %s552_s4 = smov [#allocation10]  }
  0x4d   :  { %388 = vmatprep.subr.bf16.mxu1 %v548_v0  ;;  %380 = vmatprep.subr.bf16.mxu0 %v548_v0  ;;  %v229_v18 = vsub.s32 0, %v642_v12  ;;  %v282_v47 = vsub.s32 1, %v642_v12  ;;  %s353_s29 = sshll.u32 %s552_s4, 4  ;;  %s354_s29 = int_to_ptr.vmem [resolvable:$true] %s353_s29 }
  0x4e   :  { %v207_v11 = vunpack.c.0.s8 %v206_v9  ;;  %v262_v40 = vsub.s32 %v259_v38, %v642_v12  ;;  %406 = vset.pattern.permute.xlu0 %v551_v46  ;;  %405 = vset.pattern.permute.xlu1 %v551_v46  ;;  %s512_s17 = scalar_lea.vmem %s354_s29, 32  ;;  %p517_p5 = scmp.lt.s32.totalorder %s354_s29, %s354_s29 }
  0x4f   :  { %p513_p4 = scmp.ne.s32.totalorder %s354_s29, %s512_s17  ;;  %p518_p6 = scmp.lt.s32.totalorder %s512_s17, %s512_s17 }
  0x50   :  { %389 = vmatpush3.bf16.msra.mxu1 %v409_v3  ;;  %381 = vmatpush3.bf16.msra.mxu0 %v410_v4  ;;  %v210_v13 = vsub.s32 %v207_v11, %v642_v12 }
  0x51   :  { %p519_p7 = por %p518_p6, %p517_p5 }
  0x53   :  { %391 = vmatmul.mubr.msk.bf16.vlgmr.msra.gmra.mrb[0].mxu1 %vm98_vm1, %v144_v6  ;;  %383 = vmatmul.mubr.msk.bf16.vlgmr.msra.gmra.mrb[0].mxu0 %vm98_vm1, %v411_v7  ;;  %p520_p8 = pnand %p519_p7, %p513_p4 }
 0x126   :  { %v198_v14 = vpop.f32.mrb[0].mxu1  ;;  %v136_v17 = vpop.f32.mrb[0].mxu0 }
 0x127   :  { %v211_v15 = vrot.slane %v198_v14, %v210_v13  ;;  %v392_v16 = vpop.f32.mrb[1].mxu1  ;;  %v384_v20 = vpop.f32.mrb[1].mxu0 }
 0x128   :  { %v201_v19 = vpop.f32.mrb[2].mxu1  ;;  %v139_v24 = vpop.f32.mrb[2].mxu0 }
 0x129   :  { %v212_v21 = vcombine.high %v211_v15, %v211_v15  ;;  %v219_v22 = vrot.slane %v211_v15, %v210_v13  ;;  %v393_v23 = vpop.f32.mrb[3].mxu1  ;;  %v385_v25 = vpop.f32.mrb[3].mxu0 }
 0x12b   :  { %v230_v26 = vrot.slane %v219_v22, %v229_v18  ;;  %v226_v27 = vrot.slane %v212_v21, %v210_v13 }
 0x12d   :  { %v237_v28 = vadd.f32 %v230_v26, %v136_v17  ;;  %v234_v29 = vrot.slane %v226_v27, %v229_v18 }
 0x12f   :  { %412 = vtanh.f32 %v237_v28  ;;  %v238_v30 = vadd.f32 %v234_v29, %v139_v24 }
 0x131   :  { %414 = vtanh.f32 %v238_v30 }
 0x139   :  { %v413_v32 = vpop.eup %412 }
 0x13a   :  { %v248_v33 = vmul.f32 %v413_v32, %v371_v31 }
 0x13b   :  { %v415_v34 = vpop.eup %414 }
 0x13c   :  { %v250_v35 = vsel %vm98_vm1, %v248_v33, 0.0  ;;  %v249_v36 = vmul.f32 %v415_v34, %v371_v31 }
 0x13d   :  { %251 = vadd.xlane.f32.xlu0 %v250_v35 }
 0x13e   :  { %v253_v37 = vsel %vm98_vm1, %v249_v36, 0.0 }
 0x141   :  { %254 = vadd.xlane.f32.xlu0 %v253_v37 }
 0x1ca   :  { %v252_v39 = vpop.xlane.xlu0 %251 }
 0x1cb   :  { %v263_v42 = vrot.slane %v252_v39, %v262_v40 }
 0x1ce   :  { %v255_v41 = vpop.xlane.xlu0 %254 }
 0x1cf   :  { %v267_v43 = vrot.slane %v255_v41, %v262_v40 }
 0x1d1   :  { %v269_v44 = vsel %vm268_vm2, %v267_v43, %v263_v42 }
 0x1d2   :  { %v272_v45 = vsel %vm271_vm3, %v269_v44, -inf }
 0x1d3   :  { %273 = vmax.xlane.f32.xlu1 %v272_v45 }
 0x260   :  { %v274_v48 = vpop.xlane.xlu1 %273 }
 0x261   :  { %v279_v49 = vrot.slane %v274_v48, %v229_v18  ;;  %v283_v50 = vrot.slane %v274_v48, %v282_v47 }
 0x263   :  { %v286_v51 = vsub.f32 %v252_v39, %v279_v49  ;;  %v287_v52 = vsub.f32 %v255_v41, %v283_v50 }
 0x265   :  { %v288_v53 = vmul.f32 1.442695, %v286_v51  ;;  %v290_v54 = vmul.f32 1.442695, %v287_v52 }
 0x267   :  { %416 = vpow2.f32 %v288_v53 }
 0x268   :  { %418 = vpow2.f32 %v290_v54 }
 0x271   :  { %v417_v55 = vpop.eup %416 }
 0x272   :  { %v419_v56 = vpop.eup %418  ;;  %295 = vperm.xlu1 %405, %v417_v55  }
 0x273   :  { %298 = vperm.xlu0 %406, %v419_v56  }
 0x2f1   :  { %v296_v57 = vpop.permute.xlu1 %295 }
 0x2f2   :  { %v299_v58 = vpop.permute.xlu0 %298  ;;  %v303_v59 = vrot.slane %v296_v57, %v262_v40 }
 0x2f3   :  { %v307_v60 = vrot.slane %v299_v58, %v262_v40 }
 0x2f5   :  { %v308_v61 = vsel %vm268_vm2, %v307_v60, %v303_v59 }
 0x2f6   :  { %v310_v62 = vsel %vm271_vm3, %v308_v61, 0.0 }
 0x2f7   :  { %311 = vadd.xlane.f32.xlu1 %v310_v62 }
 0x384   :  { %v312_v63 = vpop.xlane.xlu1 %311 }
 0x385   :  { %v317_v0 = vrot.slane %v312_v63, %v229_v18  ;;  %v321_v1 = vrot.slane %v312_v63, %v282_v47 }
 0x387   :  { %420 = vrcp.f32 %v317_v0 }
 0x388   :  { %422 = vrcp.f32 %v321_v1 }
 0x391   :  { %v421_v2 = vpop.eup %420 }
 0x392   :  { %v325_v3 = vmul.f32 %v421_v2, %v417_v55  ;;  %v423_v4 = vpop.eup %422 }
 0x393   :  { %v327_v5 = vmul.f32 %v423_v4, %v419_v56 }
 0x394   :  { %331 = vperm.xlu0 %406, %v325_v3  }
 0x398   :  { %334 = vperm.xlu0 %406, %v327_v5  }
 0x413   :  { %v332_v6 = vpop.permute.xlu0 %331 }
 0x414   :  { %v339_v8 = vrot.slane %v332_v6, %v262_v40 }
 0x417   :  { %v335_v7 = vpop.permute.xlu0 %334 }
 0x418   :  { %v343_v9 = vrot.slane %v335_v7, %v262_v40 }
 0x41a   :  { %v344_v10 = vsel %vm268_vm2, %v343_v9, %v339_v8 }
 0x41b   :  { %346 = vst.msk [vmem:[#allocation10] sm:$0x3] %vm271_vm3, %v344_v10 }
 0x41c   :  { %523 = shalt.err (!%p520_p8)
}
 0x41d   :  { %s524_s19 = scalar_lea.hbm %s676_s5, 32 }
 0x41e   :  { %p525_p9 = scmp.ne.s32.totalorder %s676_s5, %s524_s19  ;;  %p528_p10 = scmp.lt.u32.totalorder %s524_s19, %s676_s5 }
 0x420   :  { %p530_p11 = pnand %p528_p10, %p525_p9 }
 0x422   :  { %533 = shalt.err (!%p530_p11)
}
 0x423   :  { %356 = dma.vmem_to_hbm [thread:$0]  %s354_s29, 32, %s676_s5, [#allocation4]  }
 0x424   :  { %540 = dma.done.wait [#allocation4], 32  }
 0x425   :  { %541 = vsyncadd [#allocation4], 4294967264 }
 0x426   :  { %360 = vsyncpa [#allocation3], 1 }
 0x427   :  { %361 = vsyncpa [#allocation6], 1 }
 0x428   :  { %362 = vsyncpa [#allocation9], 1 }
 0x429   :  { %363 = vsyncpa [#allocation4], 1 }

</bundles_post_ra>
